<compile_context>
chip_gen: v7x
topology: tpu7x:2x2x1
jax: 0.10.0
libtpu: 0.0.40
codegen_flags: <defaults>
</compile_context>

<pallas_src>
import functools

import jax
import jax.numpy as jnp
from jax.experimental import pallas as pl
from jax.experimental.pallas import tpu as pltpu


def _kd_loss_kernel(s_ref, t_ref, o_ref, *, inv_t: float):
    # Load this batch tile; compute in f32 regardless of input dtype
    # (bf16 inputs stay bf16 through the DMA -> half the HBM bytes).
    s = s_ref[...].astype(jnp.float32) * inv_t
    t = t_ref[...].astype(jnp.float32) * inv_t

    # log_softmax of student logits along the class (last / lane) axis.
    s_max = jnp.max(s, axis=-1, keepdims=True)
    s_shift = s - s_max
    s_lse = jnp.log(jnp.sum(jnp.exp(s_shift), axis=-1, keepdims=True))
    log_p_s = s_shift - s_lse

    # Teacher: unnormalized exp + log_softmax (no per-element divide).
    t_max = jnp.max(t, axis=-1, keepdims=True)
    t_shift = t - t_max
    t_exp = jnp.exp(t_shift)
    t_sum = jnp.sum(t_exp, axis=-1, keepdims=True)
    log_p_t = t_shift - jnp.log(t_sum)

    # sum_c p_t * (log_p_t - log_p_s)
    #   = (1/t_sum) * sum_c t_exp * (log_p_t - log_p_s)
    row = jnp.sum(t_exp * (log_p_t - log_p_s), axis=-1, keepdims=True)  # (TB, 1)
    partial = jnp.sum(row * pl.reciprocal(t_sum, approx=False))         # scalar

    # Lane-dense partial-sum block for this tile (read back as out[i, 0, 0]).
    o_ref[...] = jnp.full(o_ref.shape, partial, dtype=jnp.float32)


def _choose_batch_tile(B: int, C: int, itemsize: int) -> int:
    """Pick a batch tile: ~2 MiB per input block, multiple of 8, capped at 512/B."""
    target_bytes = 2 * 1024 * 1024
    tb = max(8, target_bytes // max(1, C * itemsize))
    tb = min(tb, 512, B)
    if tb >= 8:
        tb = (tb // 8) * 8
    return max(tb, 1)


def kd_loss(out_s: jax.Array, out_t: jax.Array, T: float) -> jax.Array:
    """Pallas TPU implementation of KDLoss(T)(out_s, out_t). Returns a scalar."""
    assert out_s.shape == out_t.shape and out_s.ndim == 2
    B, C = out_s.shape

    tb = _choose_batch_tile(B, C, out_s.dtype.itemsize)
    num_tiles = pl.cdiv(B, tb)
    b_pad = num_tiles * tb
    if b_pad != B:
        # Pad BOTH inputs with identical zero rows: padded rows have
        # log_p_t == log_p_s exactly, so they contribute exactly 0 to the KL.
        pad = ((0, b_pad - B), (0, 0))
        out_s = jnp.pad(out_s, pad)
        out_t = jnp.pad(out_t, pad)

    # TODO(synk): for vocab-scale C (>=32k), add a class-axis grid dim with an
    # online logsumexp accumulator instead of holding full (tb, C) rows in VMEM.

    kernel = functools.partial(_kd_loss_kernel, inv_t=1.0 / float(T))
    partials = pl.pallas_call(
        kernel,
        out_shape=jax.ShapeDtypeStruct((num_tiles, 8, 128), jnp.float32),
        grid_spec=pltpu.PrefetchScalarGridSpec(
            num_scalar_prefetch=0,
            grid=(num_tiles,),
            in_specs=[
                pl.BlockSpec((tb, C), lambda i: (i, 0)),
                pl.BlockSpec((tb, C), lambda i: (i, 0)),
            ],
            out_specs=pl.BlockSpec((1, 8, 128), lambda i: (i, 0, 0)),
        ),
        compiler_params=pltpu.CompilerParams(
            dimension_semantics=("parallel",),
            vmem_limit_bytes=32 * 1024 * 1024,
        ),
    )(out_s, out_t)

    # Final tiny reduction + batchmean / temperature scaling on the host graph.
    return jnp.sum(partials[:, 0, 0]) * (float(T) * float(T) / B)


def _kd_loss_ref(out_s, out_t, T):
    """Pure-JAX reference matching F.kl_div(..., reduction='batchmean') * T * T."""
    log_p_s = jax.nn.log_softmax(out_s / T, axis=1)
    p_t = jax.nn.softmax(out_t / T, axis=1)
    log_p_t = jax.nn.log_softmax(out_t / T, axis=1)
    B = out_s.shape[0]
    return jnp.sum(p_t * (log_p_t - log_p_s)) / B * T * T


if __name__ == "__main__":
    key = jax.random.PRNGKey(0)
    k1, k2, k3, k4 = jax.random.split(key, 4)
    T = 4.0  # distillation temperature

    # Small (batch, num_classes) logits — primary check.
    B, C = 8, 32
    out_s = jax.random.normal(k1, (B, C), dtype=jnp.float32)
    out_t = jax.random.normal(k2, (B, C), dtype=jnp.float32)
    loss = kd_loss(out_s, out_t, T)
    jax.block_until_ready(loss)
    ref = _kd_loss_ref(out_s, out_t, T)
    assert jnp.allclose(loss, ref, rtol=1e-5, atol=1e-6), (loss, ref)

    # Secondary check: non-multiple batch -> exercises multi-tile grid + padding.
    B2, C2 = 20, 160
    out_s2 = jax.random.normal(k3, (B2, C2), dtype=jnp.float32)
    out_t2 = jax.random.normal(k4, (B2, C2), dtype=jnp.float32)
    loss2 = kd_loss(out_s2, out_t2, T)
    jax.block_until_ready(loss2)
    ref2 = _kd_loss_ref(out_s2, out_t2, T)
    assert jnp.allclose(loss2, ref2, rtol=1e-5, atol=1e-6), (loss2, ref2)

    print("KERNEL_OK")
</pallas_src>

<mosaic_0001>
module attributes {stable_mosaic.version = 11 : i64} {
  func.func @_kd_loss_kernel(%arg0: i32, %arg1: memref<8x32xf32, #tpu.memory_space<vmem>>, %arg2: memref<8x32xf32, #tpu.memory_space<vmem>>, %arg3: memref<1x8x128xf32, #tpu.memory_space<vmem>>) attributes {dimension_semantics = [#tpu.dimension_semantics<parallel>], iteration_bounds = array<i64: 1>, scalar_prefetch = 0 : i64, scratch_operands = 0 : i64, tpu.core_type = #tpu.core_type<tc>, window_params = [{transform_indices = @transform_0, window_bounds = array<i64: 8, 32>}, {transform_indices = @transform_1, window_bounds = array<i64: 8, 32>}, {transform_indices = @transform_2, window_bounds = array<i64: 1, 8, 128>}]} {
    %c0 = arith.constant 0 : index
    %c0_0 = arith.constant 0 : index
    %0 = vector.load %arg1[%c0, %c0_0] : memref<8x32xf32, #tpu.memory_space<vmem>>, vector<8x32xf32>
    %cst = arith.constant 2.500000e-01 : f32
    %1 = vector.broadcast %cst : f32 to vector<8x32xf32>
    %2 = arith.mulf %0, %1 : vector<8x32xf32>
    %c0_1 = arith.constant 0 : index
    %c0_2 = arith.constant 0 : index
    %3 = vector.load %arg2[%c0_1, %c0_2] : memref<8x32xf32, #tpu.memory_space<vmem>>, vector<8x32xf32>
    %cst_3 = arith.constant 2.500000e-01 : f32
    %4 = vector.broadcast %cst_3 : f32 to vector<8x32xf32>
    %5 = arith.mulf %3, %4 : vector<8x32xf32>
    %cst_4 = arith.constant dense<0xFF800000> : vector<8xf32>
    %6 = vector.multi_reduction <maximumf>, %2, %cst_4 [1] : vector<8x32xf32> to vector<8xf32>
    %7 = vector.shape_cast %6 : vector<8xf32> to vector<8x1xf32>
    %8 = vector.broadcast %7 : vector<8x1xf32> to vector<8x32xf32>
    %9 = arith.subf %2, %8 : vector<8x32xf32>
    %10 = math.exp %9 : vector<8x32xf32>
    %cst_5 = arith.constant dense<0.000000e+00> : vector<8xf32>
    %11 = vector.multi_reduction <add>, %10, %cst_5 [1] : vector<8x32xf32> to vector<8xf32>
    %12 = vector.shape_cast %11 : vector<8xf32> to vector<8x1xf32>
    %13 = math.log %12 : vector<8x1xf32>
    %14 = vector.broadcast %13 : vector<8x1xf32> to vector<8x32xf32>
    %15 = arith.subf %9, %14 : vector<8x32xf32>
    %cst_6 = arith.constant dense<0xFF800000> : vector<8xf32>
    %16 = vector.multi_reduction <maximumf>, %5, %cst_6 [1] : vector<8x32xf32> to vector<8xf32>
    %17 = vector.shape_cast %16 : vector<8xf32> to vector<8x1xf32>
    %18 = vector.broadcast %17 : vector<8x1xf32> to vector<8x32xf32>
    %19 = arith.subf %5, %18 : vector<8x32xf32>
    %20 = math.exp %19 : vector<8x32xf32>
    %cst_7 = arith.constant dense<0.000000e+00> : vector<8xf32>
    %21 = vector.multi_reduction <add>, %20, %cst_7 [1] : vector<8x32xf32> to vector<8xf32>
    %22 = vector.shape_cast %21 : vector<8xf32> to vector<8x1xf32>
    %23 = math.log %22 : vector<8x1xf32>
    %24 = vector.broadcast %23 : vector<8x1xf32> to vector<8x32xf32>
    %25 = arith.subf %19, %24 : vector<8x32xf32>
    %26 = arith.subf %25, %15 : vector<8x32xf32>
    %27 = arith.mulf %20, %26 : vector<8x32xf32>
    %cst_8 = arith.constant dense<0.000000e+00> : vector<8xf32>
    %28 = vector.multi_reduction <add>, %27, %cst_8 [1] : vector<8x32xf32> to vector<8xf32>
    %29 = vector.shape_cast %28 : vector<8xf32> to vector<8x1xf32>
    %30 = tpu.reciprocal %22 : vector<8x1xf32> -> vector<8x1xf32>
    %31 = arith.mulf %29, %30 : vector<8x1xf32>
    %32 = vector.shape_cast %31 : vector<8x1xf32> to vector<1x8x1xf32>
    %cst_9 = arith.constant dense<0.000000e+00> : vector<1xf32>
    %33 = vector.multi_reduction <add>, %32, %cst_9 [1, 2] : vector<1x8x1xf32> to vector<1xf32>
    %34 = vector.shape_cast %33 : vector<1xf32> to vector<1x1x1xf32>
    %35 = vector.extract %34[0, 0, 0] : f32 from vector<1x1x1xf32>
    %36 = vector.broadcast %35 : f32 to vector<1x8x128xf32>
    %c0_10 = arith.constant 0 : index
    %c0_11 = arith.constant 0 : index
    %c0_12 = arith.constant 0 : index
    %37 = vector.load %arg3[%c0_10, %c0_11, %c0_12] : memref<1x8x128xf32, #tpu.memory_space<vmem>>, vector<1x8x128xf32>
    tpu.vector_store %arg3[%c0_10, %c0_11, %c0_12], %36 {strides = array<i32>} : memref<1x8x128xf32, #tpu.memory_space<vmem>>, vector<1x8x128xf32>,
    return
  }
  func.func @transform_0(%arg0: i32) -> (i32, i32) {
    %c0_i32 = arith.constant 0 : i32
    %c0_i32_0 = arith.constant 0 : i32
    return %arg0, %c0_i32 : i32, i32
  }
  func.func @transform_1(%arg0: i32) -> (i32, i32) {
    %c0_i32 = arith.constant 0 : i32
    %c0_i32_0 = arith.constant 0 : i32
    return %arg0, %c0_i32 : i32, i32
  }
  func.func @transform_2(%arg0: i32) -> (i32, i32, i32) {
    %c0_i32 = arith.constant 0 : i32
    %c0_i32_0 = arith.constant 0 : i32
    %c0_i32_1 = arith.constant 0 : i32
    return %arg0, %c0_i32, %c0_i32_0 : i32, i32, i32
  }
}

</mosaic_0001>

<bundles_post_ra>
// kernel: tpu_custom_call.1
= control target key start
LH: loop header
LB: loop body
LE: loop exit
PB: predicated region body
PF: predicated region fallthrough
CT: control target
= control target key end

     0   :  { %7 = vsyncpa [#allocation3], 0  ;;  %s247_s0 = inlined_call_operand.hbm [shape: f32[8,32], index: 0, kind: input, shape index: {}]   ;;  %s248_s1 = inlined_call_operand.hbm [shape: f32[8,32], index: 1, kind: input, shape index: {}]   ;;  %s249_s2 = inlined_call_operand.hbm [shape: f32[1,8,128], index: 2, kind: output, shape index: {}]  }
   0x1   :  { %8 = vsyncpa [#allocation6], 0 }
   0x2   :  { %9 = vsyncpa [#allocation4], 0  ;;  %s188_s9 = smov [#allocation2]   ;;  %s189_s11 = smov [#allocation5]  }
   0x3   :  { %s16_s10 = sshll.u32 %s188_s9, 4  ;;  %s26_s12 = sshll.u32 %s189_s11, 4  ;;  %s17_s10 = int_to_ptr.vmem [resolvable:$true] %s16_s10  ;;  %s27_s12 = int_to_ptr.vmem [resolvable:$true] %s26_s12 }
   0x4   :  { %s116_s15 = scalar_lea.hbm %s247_s0, 128 }
   0x5   :  { %p117_p0 = scmp.ne.s32.totalorder %s247_s0, %s116_s15  ;;  %p120_p1 = scmp.lt.u32.totalorder %s116_s15, %s247_s0 }
   0x7   :  { %p122_p2 = pnand %p120_p1, %p117_p0 }
   0x9   :  { %125 = shalt.err (!%p122_p2)
}
   0xa   :  { %s126_s20 = scalar_lea.vmem %s17_s10, 128  ;;  %p131_p4 = scmp.lt.s32.totalorder %s17_s10, %s17_s10 }
   0xb   :  { %p127_p3 = scmp.ne.s32.totalorder %s17_s10, %s126_s20  ;;  %p132_p5 = scmp.lt.s32.totalorder %s126_s20, %s126_s20 }
   0xd   :  { %p133_p6 = por %p132_p5, %p131_p4 }
   0xf   :  { %p134_p7 = pnand %p133_p6, %p127_p3 }
  0x11   :  { %137 = shalt.err (!%p134_p7)
}
  0x12   :  { %19 = dma.hbm_to_vmem [thread:$0]  %s247_s0, 128, %s17_s10, [#allocation3]  }
  0x13   :  { %s138_s25 = scalar_lea.hbm %s248_s1, 128 }
  0x14   :  { %p139_p8 = scmp.ne.s32.totalorder %s248_s1, %s138_s25  ;;  %p142_p9 = scmp.lt.u32.totalorder %s138_s25, %s248_s1 }
  0x16   :  { %p144_p10 = pnand %p142_p9, %p139_p8 }
  0x18   :  { %147 = shalt.err (!%p144_p10)
}
  0x19   :  { %s148_s30 = scalar_lea.vmem %s27_s12, 128  ;;  %p153_p12 = scmp.lt.s32.totalorder %s27_s12, %s27_s12 }
  0x1a   :  { %p149_p11 = scmp.ne.s32.totalorder %s27_s12, %s148_s30  ;;  %p154_p13 = scmp.lt.s32.totalorder %s148_s30, %s148_s30 }
  0x1c   :  { %p155_p0 = por %p154_p13, %p153_p12 }
  0x1e   :  { %p156_p1 = pnand %p155_p0, %p149_p11 }
  0x20   :  { %159 = shalt.err (!%p156_p1)
}
  0x21   :  { %29 = dma.hbm_to_vmem [thread:$0]  %s248_s1, 128, %s27_s12, [#allocation6]  }
  0x22   :  { %182 = dma.done.wait [#allocation3], 128  }
  0x23   :  { %183 = vsyncadd [#allocation3], 4294967168 }
  0x24   :  { %184 = dma.done.wait [#allocation6], 128  }
  0x25   :  { %185 = vsyncadd [#allocation6], 4294967168  ;;  %v36_v0 = vld [vmem:[#allocation2] sm:$0xff]  ;;  %vm40_vm0 = vcmask 261120   ;;  %v38_v1 = vld [vmem:[#allocation5] sm:$0xff]  ;;  %vm72_vm1 = vcmask 7168  }
  0x26   :  { %v37_v2 = vmul.f32 0.25, %v36_v0  ;;  %v39_v3 = vmul.f32 0.25, %v38_v1  ;;  %s190_s1 = smov [#allocation7]  }
  0x27   :  { %s91_s4 = sshll.u32 %s190_s1, 4  ;;  %s92_s4 = int_to_ptr.vmem [resolvable:$true] %s91_s4 }
  0x28   :  { %v41_v4 = vsel %vm40_vm0, %v37_v2, -inf  ;;  %v53_v5 = vsel %vm40_vm0, %v39_v3, -inf  ;;  %s160_s6 = scalar_lea.vmem %s92_s4, 128  ;;  %p165_p3 = scmp.lt.s32.totalorder %s92_s4, %s92_s4 }
  0x29   :  { %42 = vmax.xlane.f32.xlu0 %v41_v4  ;;  %p161_p2 = scmp.ne.s32.totalorder %s92_s4, %s160_s6  ;;  %p166_p4 = scmp.lt.s32.totalorder %s160_s6, %s160_s6 }
  0x2b   :  { %p167_p5 = por %p166_p4, %p165_p3 }
  0x2d   :  { %54 = vmax.xlane.f32.xlu0 %v53_v5  ;;  %p168_p6 = pnand %p167_p5, %p161_p2 }
  0xb6   :  { %v43_v6 = vpop.xlane.xlu0 %42 }
  0xb7   :  { %v44_v7 = vsub.f32 %v37_v2, %v43_v6 }
  0xb9   :  { %v45_v8 = vmul.f32 1.442695, %v44_v7 }
  0xba   :  { %v55_v9 = vpop.xlane.xlu0 %54 }
  0xbb   :  { %106 = vpow2.f32 %v45_v8  ;;  %v56_v10 = vsub.f32 %v39_v3, %v55_v9 }
  0xbd   :  { %v57_v11 = vmul.f32 1.442695, %v56_v10 }
  0xbf   :  { %108 = vpow2.f32 %v57_v11 }
  0xc5   :  { %v107_v12 = vpop.eup %106 }
  0xc6   :  { %v47_v13 = vsel %vm40_vm0, %v107_v12, 0.0 }
  0xc7   :  { %48 = vadd.xlane.f32.xlu1 %v47_v13 }
  0xc9   :  { %v109_v14 = vpop.eup %108 }
  0xca   :  { %v59_v15 = vsel %vm40_vm0, %v109_v14, 0.0 }
  0xcb   :  { %60 = vadd.xlane.f32.xlu1 %v59_v15 }
 0x154   :  { %v49_v16 = vpop.xlane.xlu1 %48 }
 0x155   :  { %110 = vlog2.f32 %v49_v16 }
 0x158   :  { %v61_v17 = vpop.xlane.xlu1 %60 }
 0x159   :  { %112 = vlog2.f32 %v61_v17 }
 0x15a   :  { %114 = vrcp.f32 %v61_v17 }
 0x15f   :  { %v111_v18 = vpop.eup %110 }
 0x160   :  { %v51_v19 = vmul.f32 0.6931472, %v111_v18 }
 0x162   :  { %v52_v22 = vsub.f32 %v44_v7, %v51_v19 }
 0x163   :  { %v113_v20 = vpop.eup %112 }
 0x164   :  { %v63_v21 = vmul.f32 0.6931472, %v113_v20  ;;  %v115_v27 = vpop.eup %114 }
 0x166   :  { %v64_v23 = vsub.f32 %v56_v10, %v63_v21 }
 0x168   :  { %v65_v24 = vsub.f32 %v64_v23, %v52_v22 }
 0x16a   :  { %v66_v25 = vmul.f32 %v109_v14, %v65_v24 }
 0x16c   :  { %v67_v26 = vsel %vm40_vm0, %v66_v25, 0.0 }
 0x16d   :  { %68 = vadd.xlane.f32.xlu0 %v67_v26 }
 0x1fa   :  { %v69_v28 = vpop.xlane.xlu0 %68 }
 0x1fb   :  { %v71_v29 = vmul.f32 %v115_v27, %v69_v28 }
 0x1fd   :  { %v73_v30 = vsel %vm72_vm1, %v71_v29, 0.0 }
 0x1fe   :  { %74 = vadd.xlane.f32.xlu1 %v73_v30 }
 0x28b   :  { %v75_v31 = vpop.xlane.xlu1 %74 }
 0x28c   :  { %v76_v32 = vrot.slane %v75_v31, 4 }
 0x28e   :  { %v77_v33 = vadd.f32 %v76_v32, %v75_v31 }
 0x290   :  { %v78_v34 = vrot.slane %v77_v33, 2 }
 0x292   :  { %v79_v35 = vadd.f32 %v78_v34, %v77_v33 }
 0x294   :  { %v80_v36 = vrot.slane %v79_v35, 1 }
 0x296   :  { %v81_v37 = vadd.f32 %v80_v36, %v79_v35 }
 0x298   :  { %101 = vpush %v81_v37 }
 0x2c9   :  { %s102_s5 = spop %101 }
 0x2ca   :  { %v83_v38 = vstv %s102_s5 }
 0x2cb   :  { %84 = vst [vmem:[#allocation7] sm:$0xff] %v83_v38 }
 0x2cc   :  { %171 = shalt.err (!%p168_p6)
}
 0x2cd   :  { %s172_s9 = scalar_lea.hbm %s249_s2, 128 }
 0x2ce   :  { %p173_p7 = scmp.ne.s32.totalorder %s249_s2, %s172_s9  ;;  %p176_p8 = scmp.lt.u32.totalorder %s172_s9, %s249_s2 }
 0x2d0   :  { %p178_p9 = pnand %p176_p8, %p173_p7 }
 0x2d2   :  { %181 = shalt.err (!%p178_p9)
}
 0x2d3   :  { %94 = dma.vmem_to_hbm [thread:$0]  %s92_s4, 128, %s249_s2, [#allocation4]  }
 0x2d4   :  { %186 = dma.done.wait [#allocation4], 128  }
 0x2d5   :  { %187 = vsyncadd [#allocation4], 4294967168 }
 0x2d6   :  { %98 = vsyncpa [#allocation3], 1 }
 0x2d7   :  { %99 = vsyncpa [#allocation6], 1 }
 0x2d8   :  { %100 = vsyncpa [#allocation4], 1 }

</bundles_post_ra>
